<compile_context>
chip_gen: v6e
topology: v6e:2x2x1
jax: 0.10.0
libtpu: 0.0.40
codegen_flags: <defaults>
</compile_context>

<pallas_src>
import jax
import jax.numpy as jnp
from jax.experimental import pallas as pl
from jax.experimental.pallas import tpu as pltpu


# ----------------------------------------------------------------------------- #
# Kernel 1: fused make_mask reduction for all four feature tensors (one launch)
#   torch: (sum(|f|, -1) == 0).unsqueeze(1).unsqueeze(2)
# ----------------------------------------------------------------------------- #
def _make_mask_kernel(x_ref, q_ref, d_ref, qd_ref,
                      xo_ref, qo_ref, do_ref, qdo_ref):
    # Per-row |.| sum over the hidden axis (lane reduction -> XLU); four tensors
    # per grid step so everything shares one launch / one pipeline.
    xo_ref[...] = jnp.sum(jnp.abs(x_ref[...]), axis=-1)
    qo_ref[...] = jnp.sum(jnp.abs(q_ref[...]), axis=-1)
    do_ref[...] = jnp.sum(jnp.abs(d_ref[...]), axis=-1)
    qdo_ref[...] = jnp.sum(jnp.abs(qd_ref[...]), axis=-1)


def make_masks(x_tot, que_tot, dct_tot, que_tot_dct):
    """Returns the four bool masks, each (N, 1, 1, T), matching PyTorch make_mask."""
    N, T, H = x_tot.shape
    # Tile the sample axis so huge backbones (e.g. T=196, H=768) still fit VMEM.
    tn = N if N <= 8 else 8
    in_spec = pl.BlockSpec((tn, T, H), lambda n: (n, 0, 0))
    out_spec = pl.BlockSpec((tn, T), lambda n: (n, 0))
    sums = pl.pallas_call(
        _make_mask_kernel,
        out_shape=tuple(jax.ShapeDtypeStruct((N, T), x_tot.dtype) for _ in range(4)),
        grid=(pl.cdiv(N, tn),),
        in_specs=[in_spec, in_spec, in_spec, in_spec],
        out_specs=(out_spec, out_spec, out_spec, out_spec),
        compiler_params=pltpu.CompilerParams(dimension_semantics=("parallel",)),
    )(x_tot, que_tot, dct_tot, que_tot_dct)
    # The ==0 compare + unsqueeze is a trivial elementwise op; XLA fuses it.
    return tuple((s == 0)[:, None, None, :] for s in sums)


# ----------------------------------------------------------------------------- #
# Kernel 2: fused dual Linear(2H -> H) without materializing the concat.
#   x_out = x_a @ Wx_top + x_b @ Wx_bot + b_x
#   d_out = d_a @ Wd_top + d_b @ Wd_bot + b_d
# ----------------------------------------------------------------------------- #
def _dual_linear_kernel(xa_ref, xb_ref, da_ref, db_ref,
                        wxt_ref, wxb_ref, wdt_ref, wdb_ref,
                        bx_ref, bd_ref, xo_ref, do_ref):
    # Cast activations to bf16 in-VMEM (cheaper than writing bf16 copies to HBM).
    xa = xa_ref[...].astype(jnp.bfloat16)
    xb = xb_ref[...].astype(jnp.bfloat16)
    da = da_ref[...].astype(jnp.bfloat16)
    db = db_ref[...].astype(jnp.bfloat16)

    x_acc = jnp.dot(xa, wxt_ref[...], preferred_element_type=jnp.float32)
    x_acc = x_acc + jnp.dot(xb, wxb_ref[...], preferred_element_type=jnp.float32)
    d_acc = jnp.dot(da, wdt_ref[...], preferred_element_type=jnp.float32)
    d_acc = d_acc + jnp.dot(db, wdb_ref[...], preferred_element_type=jnp.float32)

    # Single fused bias-add + cast + store per output.
    xo_ref[...] = (x_acc + bx_ref[...]).astype(xo_ref.dtype)
    do_ref[...] = (d_acc + bd_ref[...]).astype(do_ref.dtype)


def dual_linear(x_a, x_b, d_a, d_b, w_x, b_x, w_d, b_d):
    """Computes, in one pallas_call:
         x_out = cat([x_a, x_b], -1) @ w_x + b_x
         d_out = cat([d_a, d_b], -1) @ w_d + b_d
       x_a/x_b/d_a/d_b: (N, T, H) f32; w_*: (2H, H); b_*: (H,). Returns two (N, T, H) f32.
    """
    N, T, H = x_a.shape
    M = N * T
    to2d = lambda t: t.reshape(M, H)

    # Small weight slices / biases: cast once in the wrapper (negligible HBM cost).
    wxt = w_x[:H].astype(jnp.bfloat16)
    wxb = w_x[H:].astype(jnp.bfloat16)
    wdt = w_d[:H].astype(jnp.bfloat16)
    wdb = w_d[H:].astype(jnp.bfloat16)
    bx = b_x.reshape(1, H).astype(jnp.float32)
    bd = b_d.reshape(1, H).astype(jnp.float32)

    # Token-axis tile: whole M if small, else 256 rows (keeps VMEM under the default
    # scoped limit even at H=768 with double-buffered activations/outputs).
    tm = M if M <= 256 else 256

    row_spec = pl.BlockSpec((tm, H), lambda m: (m, 0))
    w_spec = pl.BlockSpec((H, H), lambda m: (0, 0))     # constant block index -> no re-DMA
    b_spec = pl.BlockSpec((1, H), lambda m: (0, 0))

    x_out, d_out = pl.pallas_call(
        _dual_linear_kernel,
        out_shape=(jax.ShapeDtypeStruct((M, H), jnp.float32),
                   jax.ShapeDtypeStruct((M, H), jnp.float32)),
        grid=(pl.cdiv(M, tm),),
        in_specs=[row_spec, row_spec, row_spec, row_spec,
                  w_spec, w_spec, w_spec, w_spec,
                  b_spec, b_spec],
        out_specs=(row_spec, row_spec),
        compiler_params=pltpu.CompilerParams(dimension_semantics=("parallel",)),
    )(to2d(x_a), to2d(x_b), to2d(d_a), to2d(d_b),
      wxt, wxb, wdt, wdb, bx, bd)
    return x_out.reshape(N, T, H), d_out.reshape(N, T, H)


# ----------------------------------------------------------------------------- #
# Model wrapper (parameters initialized deterministically; matches nn.Linear shapes)
# ----------------------------------------------------------------------------- #
class FewShotModelPallas:
    def __init__(self, hidden_dim=32, way=2, shot=1, query=2, batch=1):
        self.hidden_dim = hidden_dim
        self.way, self.shot, self.query, self.batch = way, shot, query, batch
        k1, k2, k3, k4 = jax.random.split(jax.random.PRNGKey(42), 4)
        bound = 1.0 / jnp.sqrt(jnp.float32(2 * hidden_dim))  # nn.Linear default init bound
        self.x_linear_w = jax.random.uniform(k1, (2 * hidden_dim, hidden_dim), jnp.float32, -bound, bound)
        self.x_linear_b = jax.random.uniform(k2, (hidden_dim,), jnp.float32, -bound, bound)
        self.dct_linear_w = jax.random.uniform(k3, (2 * hidden_dim, hidden_dim), jnp.float32, -bound, bound)
        self.dct_linear_b = jax.random.uniform(k4, (hidden_dim,), jnp.float32, -bound, bound)
        self.temp = jnp.float32(1.0)      # nn.Parameter(torch.tensor(1.0))
        self.temp_dct = jnp.float32(1.0)  # nn.Parameter(torch.tensor(1.0))

    # -------- split_shot_query (pure reshape glue, identical axis convention) -------- #
    def _split(self, t):
        b, way, shot, query = self.batch, self.way, self.shot, self.query
        s = t.shape[1:]
        t = t.reshape(b, way, shot + query, *s)
        t_shot = t[:, :, :shot]
        t_query = t[:, :, shot:].reshape(b, way * query, *s)
        return t_shot, t_query

    def split_shot_query(self, data, que, dct):
        x_shot, x_query = self._split(data)
        que_shot, que_query = self._split(que)
        dct_shot, dct_query = self._split(dct)
        return x_shot, x_query, que_shot, que_query, dct_shot, dct_query

    # -------- forward -------- #
    def forward(self, x, que, dct, x_tot, que_tot, dct_tot, que_tot_dct,
                logits_res, logits_dct, w_r, w_f):
        x_shot, x_query, que_shot, que_query, dct_shot, dct_query = \
            self.split_shot_query(x, que, dct)
        shot_shape = x_shot.shape[:-3]
        query_shape = x_query.shape[:-3]
        img_shape = x_shot.shape[-3:]
        x_shot = x_shot.reshape(-1, *img_shape)
        x_query = x_query.reshape(-1, *img_shape)
        len_shot, len_query = x_shot.shape[0], x_query.shape[0]

        # TODO(synk): self.encoder / self.dct_encoder (ResNet12 / SwinT / ViT) and the LSTM
        # question encoders are undefined external submodules; x_tot/que_tot/dct_tot/que_tot_dct
        # (ordered [shot samples, then query samples], as produced by torch.cat([x_shot, x_query]))
        # are therefore taken as inputs here.

        # Single fused make_mask launch for all four feature tensors (no stack copy).
        img_mask, que_mask, dct_mask, que_mask_dct = make_masks(
            x_tot, que_tot, dct_tot, que_tot_dct)

        # TODO(synk): self.transformer and self.entropy are undefined external submodules
        # (cross-modal fusion + reconstruction losses); features pass through unchanged here.
        recon_loss = jnp.float32(0.0)
        recon_loss_dct = jnp.float32(0.0)
        attention_difference_loss = jnp.float32(0.0)
        attention_difference_loss_dct = jnp.float32(0.0)

        # x_linear + dct_linear in one Pallas call, no HBM concat, bf16 MXU operands.
        x_tot, dct_tot = dual_linear(
            x_tot, que_tot, dct_tot, que_tot_dct,
            self.x_linear_w, self.x_linear_b,
            self.dct_linear_w, self.dct_linear_b)

        feat_shape = x_tot.shape[1:]
        x_shot_f = x_tot[:len_shot].reshape(*shot_shape, *feat_shape)
        x_query_f = x_tot[-len_query:].reshape(*query_shape, *feat_shape)
        dct_shot_f = dct_tot[:len_shot].reshape(*shot_shape, *feat_shape)
        dct_query_f = dct_tot[-len_query:].reshape(*query_shape, *feat_shape)

        # TODO(synk): self.distillation_all is an undefined external submodule and
        # self._forward is NotImplementedError in the base class; logits_res/logits_dct
        # and the distillation weights w_r/w_f are therefore taken as inputs here.
        # Logits fusion + L2 normalize (dim=1, +1e-6 like the PyTorch source) is an
        # 8-element op -> plain jnp (a pallas_call here would be pure launch overhead).
        logits_final = self.temp * w_r * logits_res + self.temp_dct * w_f * logits_dct
        norm = jnp.sqrt(jnp.sum(logits_final * logits_final, axis=1, keepdims=True))
        logits_final = logits_final / (norm + 1e-6)

        return (logits_res, logits_dct, logits_final,
                img_mask, que_mask, dct_mask, que_mask_dct,
                x_shot_f, x_query_f, dct_shot_f, dct_query_f,
                recon_loss, recon_loss_dct,
                attention_difference_loss, attention_difference_loss_dct)


# ----------------------------------------------------------------------------- #
# Demo
# ----------------------------------------------------------------------------- #
if __name__ == "__main__":
    way, shot, query, batch = 2, 1, 2, 1
    H, T, QLEN, C, S = 32, 16, 8, 3, 16
    n_total = batch * way * (shot + query)           # 6 samples per episode
    n_query_total = batch * way * query              # 4 query samples

    key = jax.random.PRNGKey(0)
    ks = jax.random.split(key, 10)
    x = jax.random.normal(ks[0], (n_total, C, S, S), jnp.float32)          # NCHW
    que = jax.random.randint(ks[1], (n_total, QLEN), 0, 100, jnp.int32)    # token ids
    dct = jax.random.normal(ks[2], (n_total, C, S, S), jnp.float32)        # NCHW

    # Synthetic encoder outputs (N, T, H); zero a few token rows to exercise make_mask.
    x_tot = jax.random.normal(ks[3], (n_total, T, H), jnp.float32)
    x_tot = x_tot.at[0, -2:].set(0.0)
    que_tot = jax.random.normal(ks[4], (n_total, T, H), jnp.float32)
    dct_tot = jax.random.normal(ks[5], (n_total, T, H), jnp.float32)
    dct_tot = dct_tot.at[1, -1:].set(0.0)
    que_tot_dct = jax.random.normal(ks[6], (n_total, T, H), jnp.float32)

    # Synthetic metric-head logits (would come from subclass `_forward`).
    logits_res = jax.random.normal(ks[7], (n_query_total, way), jnp.float32)
    logits_dct = jax.random.normal(ks[8], (n_query_total, way), jnp.float32)
    w_r, w_f = jnp.float32(0.6), jnp.float32(0.4)

    model = FewShotModelPallas(hidden_dim=H, way=way, shot=shot, query=query, batch=batch)
    outs = model.forward(x, que, dct, x_tot, que_tot, dct_tot, que_tot_dct,
                         logits_res, logits_dct, w_r, w_f)
    jax.block_until_ready(outs)

    # ---- Sanity checks against pure-JAX references ---- #
    # 1) logits fusion + normalization
    logits_final = outs[2]
    lf_ref = 1.0 * w_r * logits_res + 1.0 * w_f * logits_dct
    lf_ref = lf_ref / (jnp.linalg.norm(lf_ref, axis=1, keepdims=True) + 1e-6)
    assert jnp.allclose(logits_final, lf_ref, atol=1e-5)

    # 2) make_mask (all four)
    ref_masks = [
        (jnp.sum(jnp.abs(f), axis=-1) == 0)[:, None, None, :]
        for f in (x_tot, que_tot, dct_tot, que_tot_dct)
    ]
    for got, ref in zip(outs[3:7], ref_masks):
        assert bool(jnp.all(got == ref))

    # 3) fused dual linear (bf16 operands -> loose tolerance)
    len_shot, len_query = batch * way * shot, batch * way * query
    x_lin = jnp.concatenate(
        [outs[7].reshape(len_shot, T, H), outs[8].reshape(len_query, T, H)], axis=0)
    d_lin = jnp.concatenate(
        [outs[9].reshape(len_shot, T, H), outs[10].reshape(len_query, T, H)], axis=0)
    x_lin_ref = (jnp.concatenate([x_tot, que_tot], -1).reshape(-1, 2 * H)
                 @ model.x_linear_w + model.x_linear_b).reshape(n_total, T, H)
    d_lin_ref = (jnp.concatenate([dct_tot, que_tot_dct], -1).reshape(-1, 2 * H)
                 @ model.dct_linear_w + model.dct_linear_b).reshape(n_total, T, H)
    assert jnp.allclose(x_lin, x_lin_ref, atol=5e-2)
    assert jnp.allclose(d_lin, d_lin_ref, atol=5e-2)

    print("KERNEL_OK")
</pallas_src>

<mosaic_0001>
module attributes {stable_mosaic.version = 11 : i64} {
  func.func @_make_mask_kernel(%arg0: i32, %arg1: memref<6x16x32xf32, #tpu.memory_space<vmem>>, %arg2: memref<6x16x32xf32, #tpu.memory_space<vmem>>, %arg3: memref<6x16x32xf32, #tpu.memory_space<vmem>>, %arg4: memref<6x16x32xf32, #tpu.memory_space<vmem>>, %arg5: memref<6x16xf32, #tpu.memory_space<vmem>>, %arg6: memref<6x16xf32, #tpu.memory_space<vmem>>, %arg7: memref<6x16xf32, #tpu.memory_space<vmem>>, %arg8: memref<6x16xf32, #tpu.memory_space<vmem>>) attributes {dimension_semantics = [#tpu.dimension_semantics<parallel>], iteration_bounds = array<i64: 1>, scalar_prefetch = 0 : i64, scratch_operands = 0 : i64, tpu.core_type = #tpu.core_type<tc>, window_params = [{transform_indices = @transform_0, window_bounds = array<i64: 6, 16, 32>}, {transform_indices = @transform_1, window_bounds = array<i64: 6, 16, 32>}, {transform_indices = @transform_2, window_bounds = array<i64: 6, 16, 32>}, {transform_indices = @transform_3, window_bounds = array<i64: 6, 16, 32>}, {transform_indices = @transform_4, window_bounds = array<i64: 6, 16>}, {transform_indices = @transform_5, window_bounds = array<i64: 6, 16>}, {transform_indices = @transform_6, window_bounds = array<i64: 6, 16>}, {transform_indices = @transform_7, window_bounds = array<i64: 6, 16>}]} {
    %c0 = arith.constant 0 : index
    %c0_0 = arith.constant 0 : index
    %c0_1 = arith.constant 0 : index
    %0 = vector.load %arg1[%c0, %c0_0, %c0_1] : memref<6x16x32xf32, #tpu.memory_space<vmem>>, vector<6x16x32xf32>
    %1 = math.absf %0 : vector<6x16x32xf32>
    %cst = arith.constant dense<0.000000e+00> : vector<6x16xf32>
    %2 = vector.multi_reduction <add>, %1, %cst [2] : vector<6x16x32xf32> to vector<6x16xf32>
    %c0_2 = arith.constant 0 : index
    %c0_3 = arith.constant 0 : index
    %3 = vector.load %arg5[%c0_2, %c0_3] : memref<6x16xf32, #tpu.memory_space<vmem>>, vector<6x16xf32>
    tpu.vector_store %arg5[%c0_2, %c0_3], %2 {strides = array<i32>} : memref<6x16xf32, #tpu.memory_space<vmem>>, vector<6x16xf32>,
    %c0_4 = arith.constant 0 : index
    %c0_5 = arith.constant 0 : index
    %c0_6 = arith.constant 0 : index
    %4 = vector.load %arg2[%c0_4, %c0_5, %c0_6] : memref<6x16x32xf32, #tpu.memory_space<vmem>>, vector<6x16x32xf32>
    %5 = math.absf %4 : vector<6x16x32xf32>
    %cst_7 = arith.constant dense<0.000000e+00> : vector<6x16xf32>
    %6 = vector.multi_reduction <add>, %5, %cst_7 [2] : vector<6x16x32xf32> to vector<6x16xf32>
    %c0_8 = arith.constant 0 : index
    %c0_9 = arith.constant 0 : index
    %7 = vector.load %arg6[%c0_8, %c0_9] : memref<6x16xf32, #tpu.memory_space<vmem>>, vector<6x16xf32>
    tpu.vector_store %arg6[%c0_8, %c0_9], %6 {strides = array<i32>} : memref<6x16xf32, #tpu.memory_space<vmem>>, vector<6x16xf32>,
    %c0_10 = arith.constant 0 : index
    %c0_11 = arith.constant 0 : index
    %c0_12 = arith.constant 0 : index
    %8 = vector.load %arg3[%c0_10, %c0_11, %c0_12] : memref<6x16x32xf32, #tpu.memory_space<vmem>>, vector<6x16x32xf32>
    %9 = math.absf %8 : vector<6x16x32xf32>
    %cst_13 = arith.constant dense<0.000000e+00> : vector<6x16xf32>
    %10 = vector.multi_reduction <add>, %9, %cst_13 [2] : vector<6x16x32xf32> to vector<6x16xf32>
    %c0_14 = arith.constant 0 : index
    %c0_15 = arith.constant 0 : index
    %11 = vector.load %arg7[%c0_14, %c0_15] : memref<6x16xf32, #tpu.memory_space<vmem>>, vector<6x16xf32>
    tpu.vector_store %arg7[%c0_14, %c0_15], %10 {strides = array<i32>} : memref<6x16xf32, #tpu.memory_space<vmem>>, vector<6x16xf32>,
    %c0_16 = arith.constant 0 : index
    %c0_17 = arith.constant 0 : index
    %c0_18 = arith.constant 0 : index
    %12 = vector.load %arg4[%c0_16, %c0_17, %c0_18] : memref<6x16x32xf32, #tpu.memory_space<vmem>>, vector<6x16x32xf32>
    %13 = math.absf %12 : vector<6x16x32xf32>
    %cst_19 = arith.constant dense<0.000000e+00> : vector<6x16xf32>
    %14 = vector.multi_reduction <add>, %13, %cst_19 [2] : vector<6x16x32xf32> to vector<6x16xf32>
    %c0_20 = arith.constant 0 : index
    %c0_21 = arith.constant 0 : index
    %15 = vector.load %arg8[%c0_20, %c0_21] : memref<6x16xf32, #tpu.memory_space<vmem>>, vector<6x16xf32>
    tpu.vector_store %arg8[%c0_20, %c0_21], %14 {strides = array<i32>} : memref<6x16xf32, #tpu.memory_space<vmem>>, vector<6x16xf32>,
    return
  }
  func.func @transform_0(%arg0: i32) -> (i32, i32, i32) {
    %c0_i32 = arith.constant 0 : i32
    %c0_i32_0 = arith.constant 0 : i32
    %c0_i32_1 = arith.constant 0 : i32
    return %arg0, %c0_i32, %c0_i32_0 : i32, i32, i32
  }
  func.func @transform_1(%arg0: i32) -> (i32, i32, i32) {
    %c0_i32 = arith.constant 0 : i32
    %c0_i32_0 = arith.constant 0 : i32
    %c0_i32_1 = arith.constant 0 : i32
    return %arg0, %c0_i32, %c0_i32_0 : i32, i32, i32
  }
  func.func @transform_2(%arg0: i32) -> (i32, i32, i32) {
    %c0_i32 = arith.constant 0 : i32
    %c0_i32_0 = arith.constant 0 : i32
    %c0_i32_1 = arith.constant 0 : i32
    return %arg0, %c0_i32, %c0_i32_0 : i32, i32, i32
  }
  func.func @transform_3(%arg0: i32) -> (i32, i32, i32) {
    %c0_i32 = arith.constant 0 : i32
    %c0_i32_0 = arith.constant 0 : i32
    %c0_i32_1 = arith.constant 0 : i32
    return %arg0, %c0_i32, %c0_i32_0 : i32, i32, i32
  }
  func.func @transform_4(%arg0: i32) -> (i32, i32) {
    %c0_i32 = arith.constant 0 : i32
    %c0_i32_0 = arith.constant 0 : i32
    return %arg0, %c0_i32 : i32, i32
  }
  func.func @transform_5(%arg0: i32) -> (i32, i32) {
    %c0_i32 = arith.constant 0 : i32
    %c0_i32_0 = arith.constant 0 : i32
    return %arg0, %c0_i32 : i32, i32
  }
  func.func @transform_6(%arg0: i32) -> (i32, i32) {
    %c0_i32 = arith.constant 0 : i32
    %c0_i32_0 = arith.constant 0 : i32
    return %arg0, %c0_i32 : i32, i32
  }
  func.func @transform_7(%arg0: i32) -> (i32, i32) {
    %c0_i32 = arith.constant 0 : i32
    %c0_i32_0 = arith.constant 0 : i32
    return %arg0, %c0_i32 : i32, i32
  }
}

</mosaic_0001>

<bundles_post_ra>
// kernel: tpu_custom_call.1
= control target key start
LH: loop header
LB: loop body
LE: loop exit
PB: predicated region body
PF: predicated region fallthrough
CT: control target
= control target key end

     0   :  { %13 = vsyncpa [#allocation3], 0  ;;  %s1147_s0 = inlined_call_operand.hbm [shape: f32[6,16,32], index: 0, kind: input, shape index: {}]   ;;  %s1148_s1 = inlined_call_operand.hbm [shape: f32[6,16,32], index: 1, kind: input, shape index: {}]   ;;  %s1149_s2 = inlined_call_operand.hbm [shape: f32[6,16,32], index: 2, kind: input, shape index: {}]   ;;  %s1150_s3 = inlined_call_operand.hbm [shape: f32[6,16,32], index: 3, kind: input, shape index: {}]   ;;  %s1151_s4 = inlined_call_operand.hbm [shape: f32[6,16], index: 4, kind: output, shape index: {0}]   ;;  %s1152_s5 = inlined_call_operand.hbm [shape: f32[6,16], index: 5, kind: output, shape index: {1}]   ;;  %s1153_s6 = inlined_call_operand.hbm [shape: f32[6,16], index: 6, kind: output, shape index: {2}]   ;;  %s1154_s7 = inlined_call_operand.hbm [shape: f32[6,16], index: 7, kind: output, shape index: {3}]  }
   0x1   :  { %14 = vsyncpa [#allocation6], 0 }
   0x2   :  { %15 = vsyncpa [#allocation9], 0 }
   0x3   :  { %16 = vsyncpa [#allocation4], 0 }
   0x4   :  { %17 = vsyncpa [#allocation12], 0 }
   0x5   :  { %18 = vsyncpa [#allocation15], 0  ;;  %s862_s24 = smov [#allocation5]   ;;  %s863_s26 = smov [#allocation2]  }
   0x6   :  { %s36_s25 = sshll.u32 %s862_s24, 4  ;;  %s24_s27 = sshll.u32 %s863_s26, 4  ;;  %s37_s25 = int_to_ptr.vmem [resolvable:$true] %s36_s25  ;;  %s25_s27 = int_to_ptr.vmem [resolvable:$true] %s24_s27 }
   0x7   :  { %s698_s28 = scalar_lea.vmem %s37_s25, 1536  ;;  %p703_p1 = scmp.lt.s32.totalorder %s37_s25, %s37_s25 }
   0x8   :  { %p699_p0 = scmp.ne.s32.totalorder %s37_s25, %s698_s28  ;;  %p704_p2 = scmp.lt.s32.totalorder %s698_s28, %s698_s28 }
   0xa   :  { %p705_p3 = por %p704_p2, %p703_p1 }
   0xc   :  { %p706_p4 = pnand %p705_p3, %p699_p0 }
   0xe   :  { %709 = shalt.err (!%p706_p4)
}
   0xf   :  { %s864_s29 = smov 128   ;;  %s865_s30 = smov 8  }
  0x10   :  { %42 = dma.hbm_to_vmem [thread:$0]  %s1148_s1, 1536, %s37_s25, [#allocation6], %s864_s29, %s864_s29, %s865_s30  }
  0x11   :  { %s718_s10 = scalar_lea.vmem %s25_s27, 1536  ;;  %p723_p6 = scmp.lt.s32.totalorder %s25_s27, %s25_s27 }
  0x12   :  { %p719_p5 = scmp.ne.s32.totalorder %s25_s27, %s718_s10  ;;  %p724_p7 = scmp.lt.s32.totalorder %s718_s10, %s718_s10 }
  0x14   :  { %p725_p8 = por %p724_p7, %p723_p6 }
  0x16   :  { %p726_p9 = pnand %p725_p8, %p719_p5 }
  0x18   :  { %729 = shalt.err (!%p726_p9)
}
  0x19   :  { %30 = dma.hbm_to_vmem [thread:$0]  %s1147_s0, 1536, %s25_s27, [#allocation3], %s864_s29, %s864_s29, %s865_s30  }
  0x1a   :  { %s866_s13 = smov [#allocation7]   ;;  %s867_s15 = smov [#allocation8]  }
  0x1b   :  { %s48_s14 = sshll.u32 %s866_s13, 4  ;;  %s60_s16 = sshll.u32 %s867_s15, 4  ;;  %s49_s14 = int_to_ptr.vmem [resolvable:$true] %s48_s14  ;;  %s61_s16 = int_to_ptr.vmem [resolvable:$true] %s60_s16 }
  0x1c   :  { %s738_s1 = scalar_lea.vmem %s49_s14, 1536  ;;  %p743_p11 = scmp.lt.s32.totalorder %s49_s14, %s49_s14 }
  0x1d   :  { %p739_p10 = scmp.ne.s32.totalorder %s49_s14, %s738_s1  ;;  %p744_p12 = scmp.lt.s32.totalorder %s738_s1, %s738_s1 }
  0x1f   :  { %p745_p13 = por %p744_p12, %p743_p11 }
  0x21   :  { %p746_p0 = pnand %p745_p13, %p739_p10 }
  0x23   :  { %749 = shalt.err (!%p746_p0)
}
  0x24   :  { %54 = dma.hbm_to_vmem [thread:$0]  %s1149_s2, 1536, %s49_s14, [#allocation6], %s864_s29, %s864_s29, %s865_s30  }
  0x25   :  { %s758_s0 = scalar_lea.vmem %s61_s16, 1536  ;;  %p763_p2 = scmp.lt.s32.totalorder %s61_s16, %s61_s16 }
  0x26   :  { %p759_p1 = scmp.ne.s32.totalorder %s61_s16, %s758_s0  ;;  %p764_p3 = scmp.lt.s32.totalorder %s758_s0, %s758_s0 }
  0x28   :  { %p765_p4 = por %p764_p3, %p763_p2 }
  0x2a   :  { %p766_p5 = pnand %p765_p4, %p759_p1 }
  0x2c   :  { %769 = shalt.err (!%p766_p5)
}
  0x2d   :  { %66 = dma.hbm_to_vmem [thread:$0]  %s1150_s3, 1536, %s61_s16, [#allocation9], %s864_s29, %s864_s29, %s865_s30  }
  0x2e   :  { %850 = dma.done.wait [#allocation3], 1536  }
  0x2f   :  { %851 = vsyncadd [#allocation3], 4294965760 }
  0x30   :  { %852 = dma.done.wait [#allocation6], 3072  }
  0x31   :  { %853 = vsyncadd [#allocation6], 4294964224 }
  0x32   :  { %854 = dma.done.wait [#allocation9], 1536  }
  0x33   :  { %855 = vsyncadd [#allocation9], 4294965760  ;;  %v81_v0 = vld [vmem:[#allocation2 + $0x10] sm:$0xff]  ;;  %vm103_vm0 = vcmask 261120   ;;  %v79_v1 = vld [vmem:[#allocation2] sm:$0xff]  ;;  %vm163_vm1 = vcmask 130112  }
  0x34   :  { %v82_v2 = vld [vmem:[#allocation2 + $0x18] sm:$0xff]  ;;  %v93_v3 = vand.u32 2147483647, %v81_v0  ;;  %v91_v4 = vand.u32 2147483647, %v79_v1  ;;  %v80_v6 = vld [vmem:[#allocation2 + $0x8] sm:$0xff] }
  0x35   :  { %v94_v5 = vand.u32 2147483647, %v82_v2  ;;  %v84_v7 = vld [vmem:[#allocation2 + $0x28] sm:$0xff]  ;;  %v83_v8 = vld [vmem:[#allocation2 + $0x20] sm:$0xff]  ;;  %v92_v11 = vand.u32 2147483647, %v80_v6 }
  0x36   :  { %v110_v9 = vsel %vm103_vm0, %v93_v3, 0.0  ;;  %v104_v10 = vsel %vm103_vm0, %v91_v4, 0.0  ;;  %v96_v14 = vand.u32 2147483647, %v84_v7  ;;  %v95_v15 = vand.u32 2147483647, %v83_v8 }
  0x37   :  { %111 = vadd.xlane.f32.xlu1 %v110_v9  ;;  %105 = vadd.xlane.f32.xlu0 %v104_v10  ;;  %v113_v12 = vsel %vm103_vm0, %v94_v5, 0.0  ;;  %v107_v13 = vsel %vm103_vm0, %v92_v11, 0.0  ;;  %v86_v16 = vld [vmem:[#allocation2 + $0x38] sm:$0xff]  ;;  %v85_v17 = vld [vmem:[#allocation2 + $0x30] sm:$0xff]  ;;  %v224_v22 = vld [vmem:[#allocation5 + $0x8] sm:$0xff]  ;;  %vm210_vm2 = vcmask 1041409  }
  0x38   :  { %v119_v18 = vsel %vm103_vm0, %v96_v14, 0.0  ;;  %v116_v19 = vsel %vm103_vm0, %v95_v15, 0.0  ;;  %v98_v20 = vand.u32 2147483647, %v86_v16  ;;  %v97_v21 = vand.u32 2147483647, %v85_v17 }
  0x39   :  { %v223_v23 = vld [vmem:[#allocation5] sm:$0xff]  ;;  %v236_v26 = vand.u32 2147483647, %v224_v22  ;;  %v226_v28 = vld [vmem:[#allocation5 + $0x18] sm:$0xff]  ;;  %v225_v29 = vld [vmem:[#allocation5 + $0x10] sm:$0xff]  ;;  %vm212_vm3 = vcmask 1042434  }
  0x3a   :  { %v125_v24 = vsel %vm103_vm0, %v98_v20, 0.0  ;;  %v122_v25 = vsel %vm103_vm0, %v97_v21, 0.0  ;;  %v235_v27 = vand.u32 2147483647, %v223_v23  ;;  %v238_v32 = vand.u32 2147483647, %v226_v28 }
  0x3b   :  { %114 = vadd.xlane.f32.xlu1 %v113_v12  ;;  %108 = vadd.xlane.f32.xlu0 %v107_v13  ;;  %v250_v30 = vsel %vm103_vm0, %v236_v26, 0.0  ;;  %v237_v33 = vand.u32 2147483647, %v225_v29  ;;  %v228_v34 = vld [vmem:[#allocation5 + $0x28] sm:$0xff]  ;;  %v227_v35 = vld [vmem:[#allocation5 + $0x20] sm:$0xff]  ;;  %v359_v46 = vld [vmem:[#allocation7 + $0x18] sm:$0xff] }
  0x3c   :  { %v247_v31 = vsel %vm103_vm0, %v235_v27, 0.0  ;;  %v256_v36 = vsel %vm103_vm0, %v238_v32, 0.0  ;;  %v240_v38 = vand.u32 2147483647, %v228_v34  ;;  %v239_v39 = vand.u32 2147483647, %v227_v35 }
  0x3d   :  { %v253_v37 = vsel %vm103_vm0, %v237_v33, 0.0  ;;  %v357_v40 = vld [vmem:[#allocation7 + $0x8] sm:$0xff]  ;;  %v356_v41 = vld [vmem:[#allocation7] sm:$0xff]  ;;  %v358_v47 = vld [vmem:[#allocation7 + $0x10] sm:$0xff]  ;;  %v371_v50 = vand.u32 2147483647, %v359_v46 }
  0x3e   :  { %v262_v42 = vsel %vm103_vm0, %v240_v38, 0.0  ;;  %v259_v43 = vsel %vm103_vm0, %v239_v39, 0.0  ;;  %v369_v44 = vand.u32 2147483647, %v357_v40  ;;  %v368_v45 = vand.u32 2147483647, %v356_v41 }
  0x3f   :  { %120 = vadd.xlane.f32.xlu1 %v119_v18  ;;  %117 = vadd.xlane.f32.xlu0 %v116_v19  ;;  %v370_v51 = vand.u32 2147483647, %v358_v47  ;;  %v490_v52 = vld [vmem:[#allocation8 + $0x8] sm:$0xff]  ;;  %v489_v53 = vld [vmem:[#allocation8] sm:$0xff]  ;;  %v389_v54 = vsel %vm103_vm0, %v371_v50, 0.0  ;;  %v492_v58 = vld [vmem:[#allocation8 + $0x18] sm:$0xff] }
  0x40   :  { %v383_v48 = vsel %vm103_vm0, %v369_v44, 0.0  ;;  %v380_v49 = vsel %vm103_vm0, %v368_v45, 0.0  ;;  %v502_v56 = vand.u32 2147483647, %v490_v52  ;;  %v501_v57 = vand.u32 2147483647, %v489_v53 }
  0x41   :  { %v386_v55 = vsel %vm103_vm0, %v370_v51, 0.0  ;;  %v491_v59 = vld [vmem:[#allocation8 + $0x10] sm:$0xff]  ;;  %v504_v62 = vand.u32 2147483647, %v492_v58  ;;  %v230_v0 = vld [vmem:[#allocation5 + $0x38] sm:$0xff]  ;;  %v361_v6 = vld [vmem:[#allocation7 + $0x28] sm:$0xff] }
  0x42   :  { %v516_v60 = vsel %vm103_vm0, %v502_v56, 0.0  ;;  %v513_v61 = vsel %vm103_vm0, %v501_v57, 0.0  ;;  %v503_v63 = vand.u32 2147483647, %v491_v59  ;;  %v229_v1 = vld [vmem:[#allocation5 + $0x30] sm:$0xff]  ;;  %v360_v7 = vld [vmem:[#allocation7 + $0x20] sm:$0xff] }
  0x43   :  { %126 = vadd.xlane.f32.xlu1 %v125_v24  ;;  %123 = vadd.xlane.f32.xlu0 %v122_v25  ;;  %v522_v2 = vsel %vm103_vm0, %v504_v62, 0.0  ;;  %v242_v4 = vand.u32 2147483647, %v230_v0  ;;  %v241_v5 = vand.u32 2147483647, %v229_v1  ;;  %v494_v12 = vld [vmem:[#allocation8 + $0x28] sm:$0xff] }
  0x44   :  { %v519_v3 = vsel %vm103_vm0, %v503_v63, 0.0  ;;  %v373_v10 = vand.u32 2147483647, %v361_v6  ;;  %v372_v11 = vand.u32 2147483647, %v360_v7  ;;  %v493_v13 = vld [vmem:[#allocation8 + $0x20] sm:$0xff] }
  0x45   :  { %v268_v8 = vsel %vm103_vm0, %v242_v4, 0.0  ;;  %v265_v9 = vsel %vm103_vm0, %v241_v5, 0.0  ;;  %v506_v16 = vand.u32 2147483647, %v494_v12  ;;  %v505_v17 = vand.u32 2147483647, %v493_v13 }
  0x46   :  { %v395_v14 = vsel %vm103_vm0, %v373_v10, 0.0  ;;  %v392_v15 = vsel %vm103_vm0, %v372_v11, 0.0  ;;  %v232_v18 = vld [vmem:[#allocation5 + $0x48] sm:$0xff]  ;;  %v231_v19 = vld [vmem:[#allocation5 + $0x40] sm:$0xff]  ;;  %v363_v24 = vld [vmem:[#allocation7 + $0x38] sm:$0xff]  ;;  %vm214_vm4 = vcmask 1043459  }
  0x47   :  { %251 = vadd.xlane.f32.xlu1 %v250_v30  ;;  %248 = vadd.xlane.f32.xlu0 %v247_v31  ;;  %v528_v20 = vsel %vm103_vm0, %v506_v16, 0.0  ;;  %v525_v21 = vsel %vm103_vm0, %v505_v17, 0.0  ;;  %v244_v22 = vand.u32 2147483647, %v232_v18  ;;  %v243_v23 = vand.u32 2147483647, %v231_v19 }
  0x48   :  { %v362_v25 = vld [vmem:[#allocation7 + $0x30] sm:$0xff]  ;;  %v375_v28 = vand.u32 2147483647, %v363_v24  ;;  %v496_v30 = vld [vmem:[#allocation8 + $0x38] sm:$0xff]  ;;  %v152_v16 = vlaneseq  ;;  %vm216_vm5 = vcmask 1044484   ;;  %s868_s2 = smov [#allocation11]  }
  0x49   :  { %v274_v26 = vsel %vm103_vm0, %v244_v22, 0.0  ;;  %v271_v27 = vsel %vm103_vm0, %v243_v23, 0.0  ;;  %v374_v29 = vand.u32 2147483647, %v362_v25  ;;  %v495_v31 = vld [vmem:[#allocation8 + $0x30] sm:$0xff]  ;;  %s638_s3 = sshll.u32 %s868_s2, 4  ;;  %s639_s3 = int_to_ptr.vmem [resolvable:$true] %s638_s3 }
  0x4a   :  { %v401_v32 = vsel %vm103_vm0, %v375_v28, 0.0  ;;  %v508_v34 = vand.u32 2147483647, %v496_v30  ;;  %v507_v35 = vand.u32 2147483647, %v495_v31  ;;  %v153_v17 = vand.u32 127, %v152_v16  ;;  %p775_p7 = scmp.lt.s32.totalorder %s639_s3, %s639_s3 }
  0x4b   :  { %257 = vadd.xlane.f32.xlu1 %v256_v36  ;;  %254 = vadd.xlane.f32.xlu0 %v253_v37  ;;  %v398_v33 = vsel %vm103_vm0, %v374_v29, 0.0  ;;  %v88_v36 = vld [vmem:[#allocation2 + $0x48] sm:$0xff]  ;;  %v87_v37 = vld [vmem:[#allocation2 + $0x40] sm:$0xff]  ;;  %v155_v18 = vshrl.u32 %v152_v16, 7  ;;  %vm218_vm6 = vcmask 1045509   ;;  %vm221_vm7 = vcmask 128000  }
  0x4c   :  { %v534_v38 = vsel %vm103_vm0, %v508_v34, 0.0  ;;  %v531_v39 = vsel %vm103_vm0, %v507_v35, 0.0  ;;  %v100_v40 = vand.u32 2147483647, %v88_v36  ;;  %v99_v41 = vand.u32 2147483647, %v87_v37 }
  0x4d   :  { %v158_v19 = vadd.s32 4294967288, %v153_v17  ;;  %v984_v22 = vsub.s32 %v153_v17, %v155_v18  ;;  %s770_s21 = scalar_lea.vmem %s639_s3, 128 }
  0x4e   :  { %v131_v44 = vsel %vm103_vm0, %v100_v40, 0.0  ;;  %v128_v45 = vsel %vm103_vm0, %v99_v41, 0.0  ;;  %p771_p6 = scmp.ne.s32.totalorder %s639_s3, %s770_s21  ;;  %p776_p8 = scmp.lt.s32.totalorder %s770_s21, %s770_s21 }
  0x4f   :  { %263 = vadd.xlane.f32.xlu1 %v262_v42  ;;  %260 = vadd.xlane.f32.xlu0 %v259_v43  ;;  %v234_v42 = vld [vmem:[#allocation5 + $0x58] sm:$0xff]  ;;  %v233_v43 = vld [vmem:[#allocation5 + $0x50] sm:$0xff]  ;;  %v986_v23 = vsub.s32 %v158_v19, %v155_v18 }
  0x50   :  { %v246_v46 = vand.u32 2147483647, %v234_v42  ;;  %v245_v47 = vand.u32 2147483647, %v233_v43  ;;  %p777_p9 = por %p776_p8, %p775_p7 }
  0x52   :  { %v280_v50 = vsel %vm103_vm0, %v246_v46, 0.0  ;;  %v277_v51 = vsel %vm103_vm0, %v245_v47, 0.0  ;;  %p778_p10 = pnand %p777_p9, %p771_p6 }
  0x53   :  { %384 = vadd.xlane.f32.xlu1 %v383_v48  ;;  %381 = vadd.xlane.f32.xlu0 %v380_v49  ;;  %v365_v48 = vld [vmem:[#allocation7 + $0x48] sm:$0xff]  ;;  %v364_v49 = vld [vmem:[#allocation7 + $0x40] sm:$0xff] }
  0x54   :  { %v377_v52 = vand.u32 2147483647, %v365_v48  ;;  %v376_v53 = vand.u32 2147483647, %v364_v49 }
  0x56   :  { %v407_v56 = vsel %vm103_vm0, %v377_v52, 0.0  ;;  %v404_v57 = vsel %vm103_vm0, %v376_v53, 0.0 }
  0x57   :  { %390 = vadd.xlane.f32.xlu1 %v389_v54  ;;  %387 = vadd.xlane.f32.xlu0 %v386_v55  ;;  %v498_v54 = vld [vmem:[#allocation8 + $0x48] sm:$0xff]  ;;  %v497_v55 = vld [vmem:[#allocation8 + $0x40] sm:$0xff] }
  0x58   :  { %v510_v58 = vand.u32 2147483647, %v498_v54  ;;  %v509_v59 = vand.u32 2147483647, %v497_v55 }
  0x5a   :  { %v540_v62 = vsel %vm103_vm0, %v510_v58, 0.0  ;;  %v537_v63 = vsel %vm103_vm0, %v509_v59, 0.0 }
  0x5b   :  { %517 = vadd.xlane.f32.xlu1 %v516_v60  ;;  %514 = vadd.xlane.f32.xlu0 %v513_v61  ;;  %v90_v60 = vld [vmem:[#allocation2 + $0x58] sm:$0xff]  ;;  %v89_v61 = vld [vmem:[#allocation2 + $0x50] sm:$0xff] }
  0x5c   :  { %v102_v0 = vand.u32 2147483647, %v90_v60  ;;  %v101_v1 = vand.u32 2147483647, %v89_v61 }
  0x5e   :  { %v137_v4 = vsel %vm103_vm0, %v102_v0, 0.0  ;;  %v134_v5 = vsel %vm103_vm0, %v101_v1, 0.0 }
  0x5f   :  { %523 = vadd.xlane.f32.xlu1 %v522_v2  ;;  %520 = vadd.xlane.f32.xlu0 %v519_v3  ;;  %v367_v2 = vld [vmem:[#allocation7 + $0x58] sm:$0xff]  ;;  %v366_v3 = vld [vmem:[#allocation7 + $0x50] sm:$0xff] }
  0x60   :  { %v379_v6 = vand.u32 2147483647, %v367_v2  ;;  %v378_v7 = vand.u32 2147483647, %v366_v3 }
  0x62   :  { %v413_v10 = vsel %vm103_vm0, %v379_v6, 0.0  ;;  %v410_v11 = vsel %vm103_vm0, %v378_v7, 0.0 }
  0x63   :  { %269 = vadd.xlane.f32.xlu1 %v268_v8  ;;  %266 = vadd.xlane.f32.xlu0 %v265_v9  ;;  %v500_v8 = vld [vmem:[#allocation8 + $0x58] sm:$0xff]  ;;  %v499_v9 = vld [vmem:[#allocation8 + $0x50] sm:$0xff] }
  0x64   :  { %v512_v12 = vand.u32 2147483647, %v500_v8  ;;  %v511_v13 = vand.u32 2147483647, %v499_v9 }
  0x67   :  { %396 = vadd.xlane.f32.xlu1 %v395_v14  ;;  %393 = vadd.xlane.f32.xlu0 %v392_v15  ;;  %v546_v14 = vsel %vm103_vm0, %v512_v12, 0.0  ;;  %v543_v15 = vsel %vm103_vm0, %v511_v13, 0.0 }
  0x6b   :  { %529 = vadd.xlane.f32.xlu1 %v528_v20  ;;  %526 = vadd.xlane.f32.xlu0 %v525_v21 }
  0x6f   :  { %275 = vadd.xlane.f32.xlu1 %v274_v26  ;;  %272 = vadd.xlane.f32.xlu0 %v271_v27 }
  0x73   :  { %402 = vadd.xlane.f32.xlu1 %v401_v32  ;;  %399 = vadd.xlane.f32.xlu0 %v398_v33 }
  0x77   :  { %535 = vadd.xlane.f32.xlu1 %v534_v38  ;;  %532 = vadd.xlane.f32.xlu0 %v531_v39 }
  0x7b   :  { %132 = vadd.xlane.f32.xlu1 %v131_v44  ;;  %129 = vadd.xlane.f32.xlu0 %v128_v45 }
  0x7f   :  { %281 = vadd.xlane.f32.xlu1 %v280_v50  ;;  %278 = vadd.xlane.f32.xlu0 %v277_v51 }
  0x83   :  { %408 = vadd.xlane.f32.xlu1 %v407_v56  ;;  %405 = vadd.xlane.f32.xlu0 %v404_v57 }
  0x87   :  { %541 = vadd.xlane.f32.xlu1 %v540_v62  ;;  %538 = vadd.xlane.f32.xlu0 %v537_v63 }
  0x8b   :  { %138 = vadd.xlane.f32.xlu1 %v137_v4  ;;  %135 = vadd.xlane.f32.xlu0 %v134_v5 }
  0x8f   :  { %414 = vadd.xlane.f32.xlu1 %v413_v10  ;;  %411 = vadd.xlane.f32.xlu0 %v410_v11 }
  0x93   :  { %547 = vadd.xlane.f32.xlu1 %v546_v14  ;;  %544 = vadd.xlane.f32.xlu0 %v543_v15 }
  0xc0   :  { %v112_v20 = vpop.xlane.xlu1 %111  ;;  %v106_v21 = vpop.xlane.xlu0 %105 }
  0xc1   :  { %v168_v26 = vrot.slane %v112_v20, %v984_v22  ;;  %v157_v27 = vrot.slane %v106_v21, %v984_v22 }
  0xc4   :  { %v115_v24 = vpop.xlane.xlu1 %114  ;;  %v109_v25 = vpop.xlane.xlu0 %108 }
  0xc5   :  { %v172_v28 = vrot.slane %v115_v24, %v986_v23  ;;  %v162_v29 = vrot.slane %v109_v25, %v986_v23 }
  0xc7   :  { %v173_v30 = vsel %vm163_vm1, %v172_v28, %v168_v26  ;;  %v164_v31 = vsel %vm163_vm1, %v162_v29, %v157_v27 }
  0xc8   :  { %v211_v32 = vsel %vm210_vm2, %v173_v30, %v164_v31  ;;  %v121_v33 = vpop.xlane.xlu1 %120  ;;  %v118_v34 = vpop.xlane.xlu0 %117 }
  0xc9   :  { %v181_v35 = vrot.slane %v121_v33, %v986_v23  ;;  %v177_v36 = vrot.slane %v118_v34, %v984_v22 }
  0xcb   :  { %v182_v37 = vsel %vm163_vm1, %v181_v35, %v177_v36 }
  0xcc   :  { %v213_v38 = vsel %vm212_vm3, %v182_v37, %v211_v32  ;;  %v127_v39 = vpop.xlane.xlu1 %126  ;;  %v124_v40 = vpop.xlane.xlu0 %123 }
  0xcd   :  { %v190_v41 = vrot.slane %v127_v39, %v986_v23  ;;  %v186_v42 = vrot.slane %v124_v40, %v984_v22 }
  0xcf   :  { %v191_v43 = vsel %vm163_vm1, %v190_v41, %v186_v42 }
  0xd0   :  { %v1003_v44 = vsel %vm214_vm4, %v191_v43, %v213_v38  ;;  %v252_v45 = vpop.xlane.xlu1 %251  ;;  %v249_v46 = vpop.xlane.xlu0 %248 }
  0xd1   :  { %v302_v11 = vrot.slane %v252_v45, %v986_v23  ;;  %v298_v12 = vrot.slane %v249_v46, %v984_v22 }
  0xd3   :  { %v303_v21 = vsel %vm163_vm1, %v302_v11, %v298_v12 }
  0xd4   :  { %v258_v47 = vpop.xlane.xlu1 %257  ;;  %v255_v48 = vpop.xlane.xlu0 %254 }
  0xd5   :  { %v311_v7 = vrot.slane %v258_v47, %v986_v23  ;;  %v307_v8 = vrot.slane %v255_v48, %v984_v22 }
  0xd7   :  { %v312_v19 = vsel %vm163_vm1, %v311_v7, %v307_v8 }
  0xd8   :  { %v264_v49 = vpop.xlane.xlu1 %263  ;;  %v261_v50 = vpop.xlane.xlu0 %260  ;;  %v349_v25 = vsel %vm210_vm2, %v312_v19, %v303_v21 }
  0xd9   :  { %v320_v9 = vrot.slane %v264_v49, %v986_v23  ;;  %v316_v10 = vrot.slane %v261_v50, %v984_v22 }
  0xdb   :  { %v321_v20 = vsel %vm163_vm1, %v320_v9, %v316_v10 }
  0xdc   :  { %v1005_v51 = vpop.xlane.xlu1 %384  ;;  %v1007_v52 = vpop.xlane.xlu0 %381  ;;  %v350_v29 = vsel %vm212_vm3, %v321_v20, %v349_v25 }
  0xdd   :  { %v435_v40 = vrot.slane %v1005_v51, %v986_v23  ;;  %v431_v41 = vrot.slane %v1007_v52, %v984_v22 }
  0xe0   :  { %v1009_v53 = vpop.xlane.xlu1 %390  ;;  %v1011_v54 = vpop.xlane.xlu0 %387 }
  0xe1   :  { %v444_v35 = vrot.slane %v1009_v53, %v986_v23  ;;  %v440_v36 = vrot.slane %v1011_v54, %v984_v22 }
  0xe4   :  { %v1013_v55 = vpop.xlane.xlu1 %517  ;;  %v1015_v56 = vpop.xlane.xlu0 %514 }
  0xe8   :  { %v1017_v57 = vpop.xlane.xlu1 %523  ;;  %v1019_v58 = vpop.xlane.xlu0 %520 }
  0xec   :  { %v270_v59 = vpop.xlane.xlu1 %269  ;;  %v267_v60 = vpop.xlane.xlu0 %266 }
  0xed   :  { %v329_v13 = vrot.slane %v270_v59, %v986_v23  ;;  %v325_v14 = vrot.slane %v267_v60, %v984_v22 }
  0xef   :  { %v330_v24 = vsel %vm163_vm1, %v329_v13, %v325_v14 }
  0xf0   :  { %v1021_v61 = vpop.xlane.xlu1 %396  ;;  %v1023_v62 = vpop.xlane.xlu0 %393  ;;  %v351_v32 = vsel %vm214_vm4, %v330_v24, %v350_v29 }
  0xf4   :  { %v1025_v63 = vpop.xlane.xlu1 %529  ;;  %v1027_v0 = vpop.xlane.xlu0 %526 }
  0xf8   :  { %v276_v1 = vpop.xlane.xlu1 %275  ;;  %v273_v2 = vpop.xlane.xlu0 %272 }
  0xf9   :  { %v338_v15 = vrot.slane %v276_v1, %v986_v23  ;;  %v334_v16 = vrot.slane %v273_v2, %v984_v22 }
  0xfb   :  { %v339_v26 = vsel %vm163_vm1, %v338_v15, %v334_v16 }
  0xfc   :  { %v1029_v3 = vpop.xlane.xlu1 %402  ;;  %v1031_v4 = vpop.xlane.xlu0 %399  ;;  %v352_v34 = vsel %vm216_vm5, %v339_v26, %v351_v32 }
 0x100   :  { %v1033_v5 = vpop.xlane.xlu1 %535  ;;  %v1035_v6 = vpop.xlane.xlu0 %532 }
 0x104   :  { %v133_v17 = vpop.xlane.xlu1 %132  ;;  %v130_v18 = vpop.xlane.xlu0 %129 }
 0x108   :  { %v282_v27 = vpop.xlane.xlu1 %281  ;;  %v279_v28 = vpop.xlane.xlu0 %278 }
 0x109   :  { %v347_v30 = vrot.slane %v282_v27, %v986_v23  ;;  %v343_v31 = vrot.slane %v279_v28, %v984_v22 }
 0x10b   :  { %v348_v33 = vsel %vm163_vm1, %v347_v30, %v343_v31 }
 0x10c   :  { %v409_v37 = vpop.xlane.xlu1 %408  ;;  %v406_v38 = vpop.xlane.xlu0 %405  ;;  %v353_v39 = vsel %vm218_vm6, %v348_v33, %v352_v34 }
 0x10d   :  { %355 = vst.msk [vmem:[#allocation11] sm:$0x3f] %vm221_vm7, %v353_v39 }
 0x10e   :  { %781 = shalt.err (!%p778_p10)
}
 0x10f   :  { %641 = dma.vmem_to_hbm [thread:$0]  %s639_s3, 128, %s1152_s5, [#allocation12]   ;;  %v445_v42 = vsel %vm163_vm1, %v444_v35, %v440_v36  ;;  %v199_v43 = vrot.slane %v133_v17, %v986_v23  ;;  %v195_v45 = vrot.slane %v130_v18, %v984_v22  ;;  %v436_v48 = vsel %vm163_vm1, %v435_v40, %v431_v41 }
 0x110   :  { %v542_v46 = vpop.xlane.xlu1 %541  ;;  %v539_v47 = vpop.xlane.xlu0 %538  ;;  %v453_v49 = vrot.slane %v1021_v61, %v986_v23  ;;  %v449_v50 = vrot.slane %v1023_v62, %v984_v22  ;;  %v462_v51 = vrot.slane %v1029_v3, %v986_v23  ;;  %v458_v52 = vrot.slane %v1031_v4, %v984_v22  ;;  %s869_s5 = smov [#allocation10]   ;;  %s870_s25 = smov [#allocation13]  }
 0x111   :  { %v482_v53 = vsel %vm210_vm2, %v445_v42, %v436_v48  ;;  %v568_v54 = vrot.slane %v1013_v55, %v986_v23  ;;  %v564_v59 = vrot.slane %v1015_v56, %v984_v22  ;;  %v200_v60 = vsel %vm163_vm1, %v199_v43, %v195_v45  ;;  %s628_s24 = sshll.u32 %s869_s5, 4  ;;  %s648_s26 = sshll.u32 %s870_s25, 4  ;;  %s629_s24 = int_to_ptr.vmem [resolvable:$true] %s628_s24  ;;  %s649_s26 = int_to_ptr.vmem [resolvable:$true] %s648_s26 }
 0x112   :  { %v471_v61 = vrot.slane %v409_v37, %v986_v23  ;;  %v467_v62 = vrot.slane %v406_v38, %v984_v22  ;;  %v577_v3 = vrot.slane %v1017_v57, %v986_v23  ;;  %v573_v4 = vrot.slane %v1019_v58, %v984_v22  ;;  %s790_s27 = scalar_lea.vmem %s629_s24, 128  ;;  %p795_p12 = scmp.lt.s32.totalorder %s629_s24, %s629_s24 }
 0x113   :  { %v454_v7 = vsel %vm163_vm1, %v453_v49, %v449_v50  ;;  %v586_v8 = vrot.slane %v1025_v63, %v986_v23  ;;  %v582_v9 = vrot.slane %v1027_v0, %v984_v22  ;;  %v463_v10 = vsel %vm163_vm1, %v462_v51, %v458_v52  ;;  %p791_p11 = scmp.ne.s32.totalorder %s629_s24, %s790_s27  ;;  %p796_p13 = scmp.lt.s32.totalorder %s790_s27, %s790_s27 }
 0x114   :  { %v139_v1 = vpop.xlane.xlu1 %138  ;;  %v136_v2 = vpop.xlane.xlu0 %135  ;;  %v595_v57 = vrot.slane %v1033_v5, %v986_v23  ;;  %v591_v58 = vrot.slane %v1035_v6, %v984_v22  ;;  %v217_v12 = vsel %vm216_vm5, %v200_v60, %v1003_v44  ;;  %v472_v13 = vsel %vm163_vm1, %v471_v61, %v467_v62 }
 0x115   :  { %v208_v55 = vrot.slane %v139_v1, %v986_v23  ;;  %v204_v56 = vrot.slane %v136_v2, %v984_v22  ;;  %v604_v63 = vrot.slane %v542_v46, %v986_v23  ;;  %v600_v0 = vrot.slane %v539_v47, %v984_v22  ;;  %p797_p0 = por %p796_p13, %p795_p12 }
 0x116   :  { %v578_v5 = vsel %vm163_vm1, %v577_v3, %v573_v4  ;;  %v483_v6 = vsel %vm212_vm3, %v454_v7, %v482_v53  ;;  %v587_v18 = vsel %vm163_vm1, %v586_v8, %v582_v9 }
 0x117   :  { %v209_v11 = vsel %vm163_vm1, %v208_v55, %v204_v56  ;;  %v484_v19 = vsel %vm214_vm4, %v463_v10, %v483_v6  ;;  %p798_p1 = pnand %p797_p0, %p791_p11 }
 0x118   :  { %v415_v14 = vpop.xlane.xlu1 %414  ;;  %v412_v15 = vpop.xlane.xlu0 %411  ;;  %v219_v16 = vsel %vm218_vm6, %v209_v11, %v217_v12 }
 0x119   :  { %v480_v17 = vrot.slane %v415_v14, %v986_v23  ;;  %v476_v44 = vrot.slane %v412_v15, %v984_v22  ;;  %222 = vst.msk [vmem:[#allocation10] sm:$0x3f] %vm221_vm7, %v219_v16 }
 0x11a   :  { %801 = shalt.err (!%p798_p1)
}
 0x11b   :  { %631 = dma.vmem_to_hbm [thread:$0]  %s629_s24, 128, %s1151_s4, [#allocation4]   ;;  %v569_v20 = vsel %vm163_vm1, %v568_v54, %v564_v59  ;;  %v596_v21 = vsel %vm163_vm1, %v595_v57, %v591_v58  ;;  %v485_v24 = vsel %vm216_vm5, %v472_v13, %v484_v19  ;;  %v481_v25 = vsel %vm163_vm1, %v480_v17, %v476_v44 }
 0x11c   :  { %v615_v26 = vsel %vm210_vm2, %v578_v5, %v569_v20  ;;  %v605_v27 = vsel %vm163_vm1, %v604_v63, %v600_v0  ;;  %v548_v28 = vpop.xlane.xlu1 %547  ;;  %v545_v29 = vpop.xlane.xlu0 %544  ;;  %v486_v30 = vsel %vm218_vm6, %v481_v25, %v485_v24  ;;  %s871_s30 = smov [#allocation14]   ;;  %s810_s4 = scalar_lea.vmem %s649_s26, 128 }
 0x11d   :  { %s658_s8 = sshll.u32 %s871_s30, 4  ;;  %v616_v31 = vsel %vm212_vm3, %v587_v18, %v615_v26  ;;  %v613_v32 = vrot.slane %v548_v28, %v986_v23  ;;  %v609_v33 = vrot.slane %v545_v29, %v984_v22  ;;  %488 = vst.msk [vmem:[#allocation13] sm:$0x3f] %vm221_vm7, %v486_v30  ;;  %p811_p2 = scmp.ne.s32.totalorder %s649_s26, %s810_s4  ;;  %s659_s8 = int_to_ptr.vmem [resolvable:$true] %s658_s8 }
 0x11e   :  { %v617_v34 = vsel %vm214_vm4, %v596_v21, %v616_v31  ;;  %p815_p3 = scmp.lt.s32.totalorder %s649_s26, %s649_s26  ;;  %p816_p4 = scmp.lt.s32.totalorder %s810_s4, %s810_s4 }
 0x120   :  { %p817_p5 = por %p816_p4, %p815_p3 }
 0x122   :  { %p818_p6 = pnand %p817_p5, %p811_p2 }
 0x124   :  { %821 = shalt.err (!%p818_p6)
}
 0x125   :  { %651 = dma.vmem_to_hbm [thread:$0]  %s649_s26, 128, %s1153_s6, [#allocation12]   ;;  %v614_v35 = vsel %vm163_vm1, %v613_v32, %v609_v33  ;;  %v618_v23 = vsel %vm216_vm5, %v605_v27, %v617_v34 }
 0x126   :  { %v619_v22 = vsel %vm218_vm6, %v614_v35, %v618_v23  ;;  %s830_s11 = scalar_lea.vmem %s659_s8, 128  ;;  %p835_p8 = scmp.lt.s32.totalorder %s659_s8, %s659_s8 }
 0x127   :  { %621 = vst.msk [vmem:[#allocation14] sm:$0x3f] %vm221_vm7, %v619_v22  ;;  %p831_p7 = scmp.ne.s32.totalorder %s659_s8, %s830_s11  ;;  %p836_p9 = scmp.lt.s32.totalorder %s830_s11, %s830_s11 }
 0x129   :  { %p837_p10 = por %p836_p9, %p835_p8 }
 0x12b   :  { %p838_p11 = pnand %p837_p10, %p831_p7 }
 0x12d   :  { %841 = shalt.err (!%p838_p11)
}
 0x12e   :  { %661 = dma.vmem_to_hbm [thread:$0]  %s659_s8, 128, %s1154_s7, [#allocation15]  }
 0x12f   :  { %856 = dma.done.wait [#allocation4], 128  }
 0x130   :  { %857 = vsyncadd [#allocation4], 4294967168 }
 0x131   :  { %858 = dma.done.wait [#allocation12], 256  }
 0x132   :  { %859 = vsyncadd [#allocation12], 4294967040 }
 0x133   :  { %860 = dma.done.wait [#allocation15], 128  }
 0x134   :  { %861 = vsyncadd [#allocation15], 4294967168 }
 0x135   :  { %674 = vsyncpa [#allocation3], 1 }
 0x136   :  { %675 = vsyncpa [#allocation6], 1 }
 0x137   :  { %676 = vsyncpa [#allocation9], 1 }
 0x138   :  { %677 = vsyncpa [#allocation4], 1 }
 0x139   :  { %678 = vsyncpa [#allocation12], 1 }
 0x13a   :  { %679 = vsyncpa [#allocation15], 1 }

</bundles_post_ra>
